<compile_context>
chip_gen: v5e
topology: v5e:2x2
jax: 0.10.0
libtpu: 0.0.40
codegen_flags: <defaults>
</compile_context>

<pallas_src>
import functools

import jax
import jax.numpy as jnp
from jax.experimental import pallas as pl
from jax.experimental.pallas import tpu as pltpu


_LANE = 128      # last-dim tile granularity (vreg lanes)
_SUBLANE = 8     # second-to-last-dim granularity for 32-bit dtypes


def _round_up(x: int, m: int) -> int:
    return (x + m - 1) // m * m


# ---------------------------------------------------------------------------
# Generation-aware VMEM budget + single-buffer capability probe.
# ---------------------------------------------------------------------------
@functools.lru_cache(maxsize=None)
def _vmem_limit_bytes() -> int:
    """~75% of per-core VMEM (48 MiB on v7x, 96 MiB on v5e/v6e)."""
    try:
        cap = int(pltpu.get_tpu_info().vmem_capacity_bytes)
    except Exception:
        cap = 64 << 20  # conservative (v7x per-core VMEM)
    return (cap * 3) // 4


@functools.lru_cache(maxsize=None)
def _single_buffer_supported() -> bool:
    """Probe whether pipeline_mode=pl.Buffered(1) lowers on this install."""
    try:
        def _k(x_ref, o_ref):
            o_ref[...] = x_ref[...]

        out = pl.pallas_call(
            _k,
            out_shape=jax.ShapeDtypeStruct((8, 128), jnp.float32),
            grid=(1,),
            in_specs=[pl.BlockSpec((8, 128), lambda i: (0, 0),
                                   pipeline_mode=pl.Buffered(1))],
            out_specs=pl.BlockSpec((8, 128), lambda i: (0, 0)),
        )(jnp.zeros((8, 128), jnp.float32))
        jax.block_until_ready(out)
        return True
    except Exception:
        return False


def _resident_weight_spec(shape):
    """Full-array, grid-invariant weight block; single-buffered when possible."""
    if _single_buffer_supported():
        return pl.BlockSpec(shape, lambda i: (0, 0), pipeline_mode=pl.Buffered(1))
    return pl.BlockSpec(shape, lambda i: (0, 0))


def _weight_buffer_multiplier() -> int:
    return 1 if _single_buffer_supported() else 2


# ---------------------------------------------------------------------------
# Tile selection helpers.
# ---------------------------------------------------------------------------
def _pick_row_tile(M: int, granule: int, cap: int) -> int:
    """Row (M) tile: multiple of `granule`, <= cap, limited padding waste,
    and >=2 grid steps along M when possible (v7x dual TensorCore)."""
    tm = min(cap, _round_up(M, granule))
    # Keep padded-row waste <= 25% of the padded extent.
    while tm > granule:
        m_pad = _round_up(M, tm)
        if 4 * (m_pad - M) <= m_pad:
            break
        tm = max(granule, _round_up(tm // 2, granule))
    # Prefer >=2 steps on the "parallel" M axis so both v7x TCs get work.
    while tm > granule and _round_up(M, tm) // tm < 2:
        tm = max(granule, _round_up(tm // 2, granule))
    return tm


def _divisor_tile(dim_pad: int, target: int, granule: int = _LANE) -> int:
    """Largest multiple of `granule` that divides dim_pad and is <= target."""
    t = min(target, dim_pad)
    t = max(granule, (t // granule) * granule)
    while t > granule and dim_pad % t:
        t -= granule
    return t


# ---------------------------------------------------------------------------
# Weight-resident kernel (used both fused-all-layers and per-layer).
# ---------------------------------------------------------------------------
def _resident_mlp_kernel(*refs, num_layers: int, compute_dtype, last_relu: bool):
    x_ref = refs[0]
    w_refs = refs[1:1 + num_layers]
    o_ref = refs[1 + num_layers]

    h = x_ref[...].astype(compute_dtype)
    for i in range(num_layers):
        acc = jnp.dot(h, w_refs[i][...], preferred_element_type=jnp.float32)
        is_last = i == num_layers - 1
        if (not is_last) or last_relu:
            acc = jnp.maximum(acc, 0.0)
        if is_last:
            o_ref[...] = acc.astype(o_ref.dtype)
        else:
            h = acc.astype(compute_dtype)


def _resident_call(x_p, w_list, tm, out_dtype, compute_dtype, *, last_relu):
    """Grid over M only; all weights in `w_list` fully resident in VMEM."""
    M_pad, K0 = x_p.shape
    N_out = w_list[-1].shape[1]
    num_layers = len(w_list)

    in_specs = [pl.BlockSpec((tm, K0), lambda i: (i, 0))]
    for w in w_list:
        in_specs.append(_resident_weight_spec(w.shape))

    flops = 2 * M_pad * sum(int(w.shape[0]) * int(w.shape[1]) for w in w_list)
    bytes_accessed = (
        int(x_p.size) * x_p.dtype.itemsize
        + sum(int(w.size) * w.dtype.itemsize for w in w_list)
        + M_pad * N_out * jnp.dtype(out_dtype).itemsize
    )

    kernel = functools.partial(
        _resident_mlp_kernel, num_layers=num_layers,
        compute_dtype=compute_dtype, last_relu=last_relu,
    )
    return pl.pallas_call(
        kernel,
        out_shape=jax.ShapeDtypeStruct((M_pad, N_out), out_dtype),
        grid_spec=pltpu.PrefetchScalarGridSpec(
            num_scalar_prefetch=0,
            grid=(M_pad // tm,),
            in_specs=in_specs,
            out_specs=pl.BlockSpec((tm, N_out), lambda i: (i, 0)),
        ),
        compiler_params=pltpu.CompilerParams(
            dimension_semantics=("parallel",),
            vmem_limit_bytes=_vmem_limit_bytes(),
        ),
        cost_estimate=pl.CostEstimate(
            flops=int(flops), transcendentals=0, bytes_accessed=int(bytes_accessed)
        ),
    )(x_p, *w_list)


# ---------------------------------------------------------------------------
# Streamed fallback: (M, N, K) grid, f32 VMEM accumulator, K-axis last.
# Inputs are already padded (M_pad % tm == 0, K/N multiples of 128) so no
# re-padding / slicing happens here.
# ---------------------------------------------------------------------------
def _linear_kernel(x_ref, w_ref, o_ref, acc_ref, *, apply_relu: bool, compute_dtype):
    @pl.when(pl.program_id(2) == 0)
    def _():
        acc_ref[...] = jnp.zeros_like(acc_ref)

    acc_ref[...] += jnp.dot(x_ref[...].astype(compute_dtype), w_ref[...],
                            preferred_element_type=jnp.float32)

    @pl.when(pl.program_id(2) == pl.num_programs(2) - 1)
    def _():
        acc = acc_ref[...]
        if apply_relu:
            acc = jnp.maximum(acc, 0.0)
        o_ref[...] = acc.astype(o_ref.dtype)


def _linear_streamed(x_p, w_p, *, apply_relu, out_dtype, compute_dtype, tm,
                     tn_target=1024, tk_target=1024):
    M_pad, K_pad = x_p.shape
    Kw, N_pad = w_p.shape
    assert K_pad == Kw and M_pad % tm == 0

    tn = _divisor_tile(N_pad, tn_target)
    tk = _divisor_tile(K_pad, tk_target)

    flops = 2 * M_pad * K_pad * N_pad
    bytes_accessed = (
        int(x_p.size) * x_p.dtype.itemsize
        + int(w_p.size) * w_p.dtype.itemsize
        + M_pad * N_pad * jnp.dtype(out_dtype).itemsize
    )

    return pl.pallas_call(
        functools.partial(_linear_kernel, apply_relu=apply_relu,
                          compute_dtype=compute_dtype),
        out_shape=jax.ShapeDtypeStruct((M_pad, N_pad), out_dtype),
        grid_spec=pltpu.PrefetchScalarGridSpec(
            num_scalar_prefetch=0,
            grid=(M_pad // tm, N_pad // tn, K_pad // tk),
            in_specs=[
                pl.BlockSpec((tm, tk), lambda i, j, k: (i, k)),
                pl.BlockSpec((tk, tn), lambda i, j, k: (k, j)),
            ],
            out_specs=pl.BlockSpec((tm, tn), lambda i, j, k: (i, j)),
            scratch_shapes=[pltpu.VMEM((tm, tn), jnp.float32)],
        ),
        compiler_params=pltpu.CompilerParams(
            dimension_semantics=("parallel", "parallel", "arbitrary"),
            vmem_limit_bytes=_vmem_limit_bytes(),
        ),
        cost_estimate=pl.CostEstimate(
            flops=int(flops), transcendentals=0, bytes_accessed=int(bytes_accessed)
        ),
    )(x_p, w_p)


# ---------------------------------------------------------------------------
# Params (init + one-time prepare) and forward.
# ---------------------------------------------------------------------------
def init_mlp_params(key, embedding_dim, mlp_num_layers, mlp_hidden_dim):
    """Mirror nn.Linear default init (uniform +/- 1/sqrt(fan_in)), bias=False.
    Weights stored as (in_features, out_features): x @ w == x @ weight.T."""
    weights = []
    cur_dim = embedding_dim
    for _ in range(mlp_num_layers - 1):
        key, sub = jax.random.split(key)
        bound = 1.0 / (cur_dim ** 0.5)
        weights.append(
            jax.random.uniform(sub, (cur_dim, mlp_hidden_dim),
                               minval=-bound, maxval=bound, dtype=jnp.float32)
        )
        cur_dim = mlp_hidden_dim
    key, sub = jax.random.split(key)
    bound = 1.0 / (cur_dim ** 0.5)
    weights.append(
        jax.random.uniform(sub, (cur_dim, embedding_dim),
                           minval=-bound, maxval=bound, dtype=jnp.float32)
    )
    return weights


def prepare_mlp_params(weights, compute_dtype=jnp.bfloat16):
    """One-time: pad every feature dim to a lane (128) multiple and cast to
    the compute dtype, so mlp_forward never touches the weights again."""
    dims = [int(weights[0].shape[0])] + [int(w.shape[1]) for w in weights]
    dims_pad = [_round_up(d, _LANE) for d in dims]
    w_p = []
    for i, w in enumerate(weights):
        pad_k = dims_pad[i] - w.shape[0]
        pad_n = dims_pad[i + 1] - w.shape[1]
        wp = jnp.pad(w, ((0, pad_k), (0, pad_n))) if (pad_k or pad_n) else w
        w_p.append(wp.astype(compute_dtype))
    return {
        "weights": tuple(w_p),
        "dims": tuple(dims),
        "dims_pad": tuple(dims_pad),
        "compute_dtype": jnp.dtype(compute_dtype),
    }


def mlp_forward(xs, params, *, force_path=None):
    """xs: (B, S, embedding_dim) -> (B, S, embedding_dim).
    params: output of prepare_mlp_params (pre-padded, pre-cast weights).
    force_path: None | "fused" | "resident" | "streamed" (testing hook)."""
    w_p = params["weights"]
    dims = params["dims"]
    dims_pad = params["dims_pad"]
    compute_dtype = params["compute_dtype"]

    B, S, D_in = xs.shape
    assert D_in == dims[0], "input feature dim mismatch"
    D_out = dims[-1]
    M = B * S
    out_dtype = xs.dtype
    x2 = xs.reshape(M, D_in)

    c_it = jnp.dtype(compute_dtype).itemsize
    x_it = jnp.dtype(x2.dtype).itemsize
    o_it = jnp.dtype(out_dtype).itemsize
    granule = max(_SUBLANE, 32 // c_it)          # 8 for f32, 16 for bf16, 32 for 8-bit
    budget = max(_vmem_limit_bytes() - (4 << 20), 8 << 20)
    wmul = _weight_buffer_multiplier()
    max_dim_pad = max(dims_pad)

    def resident_bytes(w_list, tm, k_pad, n_pad):
        w_bytes = wmul * sum(int(w.size) for w in w_list) * c_it
        io_bytes = 2 * tm * k_pad * x_it + 2 * tm * n_pad * o_it
        inter_bytes = 2 * tm * max_dim_pad * 4   # live f32 intermediates
        return w_bytes + io_bytes + inter_bytes

    # --- pick path -----------------------------------------------------------
    tm_fused = _pick_row_tile(M, granule, cap=256)
    tm_layer = _pick_row_tile(M, granule, cap=512)
    fused_ok = resident_bytes(w_p, tm_fused, dims_pad[0], dims_pad[-1]) <= budget

    if force_path is not None:
        path = force_path
    else:
        path = "fused" if fused_ok else "layered"

    tm = tm_fused if path == "fused" else tm_layer
    M_pad = _round_up(M, tm)

    # --- pad activations only if needed --------------------------------------
    pad_m = M_pad - M
    pad_k = dims_pad[0] - D_in
    x_p = x2 if (pad_m == 0 and pad_k == 0) else jnp.pad(x2, ((0, pad_m), (0, pad_k)))

    # --- run -----------------------------------------------------------------
    if path == "fused":
        out_p = _resident_call(x_p, list(w_p), tm, out_dtype, compute_dtype,
                               last_relu=False)
    else:
        h = x_p
        n_layers = len(w_p)
        for i, w in enumerate(w_p):
            is_last = i == n_layers - 1
            layer_out_dtype = out_dtype if is_last else compute_dtype
            layer_resident = resident_bytes([w], tm, w.shape[0], w.shape[1]) <= budget
            if path == "streamed" or (path not in ("resident",) and not layer_resident):
                h = _linear_streamed(h, w, apply_relu=not is_last,
                                     out_dtype=layer_out_dtype,
                                     compute_dtype=compute_dtype, tm=tm)
            else:
                h = _resident_call(h, [w], tm, layer_out_dtype, compute_dtype,
                                   last_relu=not is_last)
        out_p = h

    if M_pad != M or dims_pad[-1] != D_out:
        out_p = out_p[:M, :D_out]
    return out_p.reshape(B, S, D_out)


def mlp_reference(xs, weights):
    h = xs
    n_layers = len(weights)
    for i, w in enumerate(weights):
        h = jnp.einsum("bsd,dh->bsh", h, w)
        if i != n_layers - 1:
            h = jnp.maximum(h, 0.0)
    return h


if __name__ == "__main__":
    config = dict(embedding_dim=32, mlp_num_layers=3, mlp_hidden_dim=64)
    B, S = 2, 8

    key = jax.random.PRNGKey(0)
    key, xkey = jax.random.split(key)
    xs = jax.random.normal(xkey, (B, S, config["embedding_dim"]), dtype=jnp.float32)

    weights = init_mlp_params(
        key, config["embedding_dim"], config["mlp_num_layers"], config["mlp_hidden_dim"]
    )
    ref = mlp_reference(xs, weights)

    # 1) f32 compute, fused (auto) path: exact-ish vs reference.
    params_f32 = prepare_mlp_params(weights, compute_dtype=jnp.float32)
    out_f32 = jax.block_until_ready(mlp_forward(xs, params_f32))
    assert out_f32.shape == xs.shape
    assert jnp.allclose(out_f32, ref, atol=1e-4, rtol=1e-4)

    # 2) f32 compute, per-layer weight-resident path.
    out_res = jax.block_until_ready(mlp_forward(xs, params_f32, force_path="resident"))
    assert jnp.allclose(out_res, ref, atol=1e-4, rtol=1e-4)

    # 3) f32 compute, streamed (M/N/K-tiled) path.
    out_str = jax.block_until_ready(mlp_forward(xs, params_f32, force_path="streamed"))
    assert jnp.allclose(out_str, ref, atol=1e-4, rtol=1e-4)

    # 4) default bf16 compute (f32 accumulation on MXU): loose tolerance.
    params_bf16 = prepare_mlp_params(weights)  # bf16, padded once
    out_bf16 = jax.block_until_ready(mlp_forward(xs, params_bf16))
    assert out_bf16.dtype == xs.dtype
    assert jnp.allclose(out_bf16, ref, atol=5e-2, rtol=5e-2)

    print("KERNEL_OK")
</pallas_src>

<mosaic_0001>
module attributes {stable_mosaic.version = 11 : i64} {
  func.func @_k(%arg0: i32, %arg1: memref<8x128xf32, #tpu.memory_space<vmem>>, %arg2: memref<8x128xf32, #tpu.memory_space<vmem>>) attributes {dimension_semantics = [#tpu.dimension_semantics<arbitrary>], iteration_bounds = array<i64: 1>, scalar_prefetch = 0 : i64, scratch_operands = 0 : i64, tpu.core_type = #tpu.core_type<tc>, window_params = [{pipeline_mode = #tpu.pipeline_mode<synchronous>, transform_indices = @transform_0, window_bounds = array<i64: 8, 128>}, {pipeline_mode = #tpu.pipeline_mode<synchronous>, transform_indices = @transform_1, window_bounds = array<i64: 8, 128>}]} {
    %c0 = arith.constant 0 : index
    %c0_0 = arith.constant 0 : index
    %0 = vector.load %arg1[%c0, %c0_0] : memref<8x128xf32, #tpu.memory_space<vmem>>, vector<8x128xf32>
    %c0_1 = arith.constant 0 : index
    %c0_2 = arith.constant 0 : index
    %1 = vector.load %arg2[%c0_1, %c0_2] : memref<8x128xf32, #tpu.memory_space<vmem>>, vector<8x128xf32>
    tpu.vector_store %arg2[%c0_1, %c0_2], %0 {strides = array<i32>} : memref<8x128xf32, #tpu.memory_space<vmem>>, vector<8x128xf32>,
    return
  }
  func.func @transform_0(%arg0: i32) -> (i32, i32) {
    %c0_i32 = arith.constant 0 : i32
    %c0_i32_0 = arith.constant 0 : i32
    %c0_i32_1 = arith.constant 0 : i32
    return %c0_i32, %c0_i32_0 : i32, i32
  }
  func.func @transform_1(%arg0: i32) -> (i32, i32) {
    %c0_i32 = arith.constant 0 : i32
    %c0_i32_0 = arith.constant 0 : i32
    %c0_i32_1 = arith.constant 0 : i32
    return %c0_i32, %c0_i32_0 : i32, i32
  }
}

module attributes {stable_mosaic.version = 11 : i64} {
  func.func @_resident_mlp_kernel(%arg0: i32, %arg1: memref<8x128xf32, #tpu.memory_space<vmem>>, %arg2: memref<128x128xf32, #tpu.memory_space<vmem>>, %arg3: memref<128x128xf32, #tpu.memory_space<vmem>>, %arg4: memref<128x128xf32, #tpu.memory_space<vmem>>, %arg5: memref<8x128xf32, #tpu.memory_space<vmem>>) attributes {dimension_semantics = [#tpu.dimension_semantics<parallel>], iteration_bounds = array<i64: 2>, scalar_prefetch = 0 : i64, scratch_operands = 0 : i64, tpu.core_type = #tpu.core_type<tc>, window_params = [{transform_indices = @transform_0, window_bounds = array<i64: 8, 128>}, {pipeline_mode = #tpu.pipeline_mode<synchronous>, transform_indices = @transform_1, window_bounds = array<i64: 128, 128>}, {pipeline_mode = #tpu.pipeline_mode<synchronous>, transform_indices = @transform_2, window_bounds = array<i64: 128, 128>}, {pipeline_mode = #tpu.pipeline_mode<synchronous>, transform_indices = @transform_3, window_bounds = array<i64: 128, 128>}, {transform_indices = @transform_4, window_bounds = array<i64: 8, 128>}]} {
    %c0 = arith.constant 0 : index
    %c0_0 = arith.constant 0 : index
    %0 = vector.load %arg1[%c0, %c0_0] : memref<8x128xf32, #tpu.memory_space<vmem>>, vector<8x128xf32>
    %c0_1 = arith.constant 0 : index
    %c0_2 = arith.constant 0 : index
    %1 = vector.load %arg2[%c0_1, %c0_2] : memref<128x128xf32, #tpu.memory_space<vmem>>, vector<128x128xf32>
    %cst = arith.constant dense<0.000000e+00> : vector<8x128xf32>
    %2 = tpu.matmul %0, %1, %cst {dimension_numbers = #tpu.dot_dimension_numbers<[1], [0], [0], [1], [0, 0, 1, 1], [], []>} : vector<8x128xf32>, vector<128x128xf32>, vector<8x128xf32> -> vector<8x128xf32>
    %cst_3 = arith.constant 0.000000e+00 : f32
    %3 = vector.broadcast %cst_3 : f32 to vector<8x128xf32>
    %4 = arith.maximumf %2, %3 : vector<8x128xf32>
    %c0_4 = arith.constant 0 : index
    %c0_5 = arith.constant 0 : index
    %5 = vector.load %arg3[%c0_4, %c0_5] : memref<128x128xf32, #tpu.memory_space<vmem>>, vector<128x128xf32>
    %cst_6 = arith.constant dense<0.000000e+00> : vector<8x128xf32>
    %6 = tpu.matmul %4, %5, %cst_6 {dimension_numbers = #tpu.dot_dimension_numbers<[1], [0], [0], [1], [0, 0, 1, 1], [], []>} : vector<8x128xf32>, vector<128x128xf32>, vector<8x128xf32> -> vector<8x128xf32>
    %cst_7 = arith.constant 0.000000e+00 : f32
    %7 = vector.broadcast %cst_7 : f32 to vector<8x128xf32>
    %8 = arith.maximumf %6, %7 : vector<8x128xf32>
    %c0_8 = arith.constant 0 : index
    %c0_9 = arith.constant 0 : index
    %9 = vector.load %arg4[%c0_8, %c0_9] : memref<128x128xf32, #tpu.memory_space<vmem>>, vector<128x128xf32>
    %cst_10 = arith.constant dense<0.000000e+00> : vector<8x128xf32>
    %10 = tpu.matmul %8, %9, %cst_10 {dimension_numbers = #tpu.dot_dimension_numbers<[1], [0], [0], [1], [0, 0, 1, 1], [], []>} : vector<8x128xf32>, vector<128x128xf32>, vector<8x128xf32> -> vector<8x128xf32>
    %c0_11 = arith.constant 0 : index
    %c0_12 = arith.constant 0 : index
    %11 = vector.load %arg5[%c0_11, %c0_12] : memref<8x128xf32, #tpu.memory_space<vmem>>, vector<8x128xf32>
    tpu.vector_store %arg5[%c0_11, %c0_12], %10 {strides = array<i32>} : memref<8x128xf32, #tpu.memory_space<vmem>>, vector<8x128xf32>,
    return
  }
  func.func @transform_0(%arg0: i32) -> (i32, i32) {
    %c0_i32 = arith.constant 0 : i32
    %c0_i32_0 = arith.constant 0 : i32
    return %arg0, %c0_i32 : i32, i32
  }
  func.func @transform_1(%arg0: i32) -> (i32, i32) {
    %c0_i32 = arith.constant 0 : i32
    %c0_i32_0 = arith.constant 0 : i32
    %c0_i32_1 = arith.constant 0 : i32
    return %c0_i32, %c0_i32_0 : i32, i32
  }
  func.func @transform_2(%arg0: i32) -> (i32, i32) {
    %c0_i32 = arith.constant 0 : i32
    %c0_i32_0 = arith.constant 0 : i32
    %c0_i32_1 = arith.constant 0 : i32
    return %c0_i32, %c0_i32_0 : i32, i32
  }
  func.func @transform_3(%arg0: i32) -> (i32, i32) {
    %c0_i32 = arith.constant 0 : i32
    %c0_i32_0 = arith.constant 0 : i32
    %c0_i32_1 = arith.constant 0 : i32
    return %c0_i32, %c0_i32_0 : i32, i32
  }
  func.func @transform_4(%arg0: i32) -> (i32, i32) {
    %c0_i32 = arith.constant 0 : i32
    %c0_i32_0 = arith.constant 0 : i32
    return %arg0, %c0_i32 : i32, i32
  }
}

</mosaic_0001>

<bundles_post_ra>
// kernel: tpu_custom_call.1
= control target key start
LH: loop header
LB: loop body
LE: loop exit
PB: predicated region body
PF: predicated region fallthrough
CT: control target
= control target key end

     0   :  { %6 = vsyncpa [#allocation3], 0  ;;  %s114_s0 = inlined_call_operand.hbm [shape: f32[8,128], index: 0, kind: input, shape index: {}]   ;;  %s115_s1 = inlined_call_operand.hbm [shape: f32[8,128], index: 1, kind: output, shape index: {}]  }
   0x1   :  { %7 = vsyncpa [#allocation4], 0  ;;  %s13_s8 = sshll.u32 %s114_s0, 4  ;;  %s96_s9 = smov [#allocation2]   ;;  %s14_s8 = int_to_ptr.hbm [resolvable:$true] %s13_s8 }
   0x2   :  { %s15_s10 = sshll.u32 %s96_s9, 4  ;;  %s16_s10 = int_to_ptr.vmem [resolvable:$true] %s15_s10 }
   0x3   :  { %18 = dma.hbm_to_vmem [thread:$0]  %s14_s8, 128, %s16_s10, [#allocation3]  }
   0x4   :  { %92 = dma.done.wait [#allocation3], 128  }
   0x5   :  { %93 = vsyncadd [#allocation3], 4294967168  ;;  %s97_s11 = smov [#allocation5]   ;;  %s32_s15 = sshll.u32 %s115_s1, 4  ;;  %v23_v0 = vld [vmem:[#allocation2] sm:$0xff]  ;;  %s33_s15 = int_to_ptr.hbm [resolvable:$true] %s32_s15 }
   0x6   :  { %s30_s12 = sshll.u32 %s97_s11, 4  ;;  %24 = vst [vmem:[#allocation5] sm:$0xff] %v23_v0  ;;  %s31_s12 = int_to_ptr.vmem [resolvable:$true] %s30_s12 }
   0x7   :  { %35 = dma.vmem_to_hbm [thread:$0]  %s31_s12, 128, %s33_s15, [#allocation4]  }
   0x8   :  { %94 = dma.done.wait [#allocation4], 128  }
   0x9   :  { %95 = vsyncadd [#allocation4], 4294967168 }
   0xa   :  { %40 = vsyncpa [#allocation3], 1 }
   0xb   :  { %41 = vsyncpa [#allocation4], 1 }

// kernel: tpu_custom_call.1
= control target key start
LH: loop header
LB: loop body
LE: loop exit
PB: predicated region body
PF: predicated region fallthrough
CT: control target
= control target key end

     0   :  { %9 = vsyncpa [#allocation3], 0  ;;  %s978_s0 = inlined_call_operand.hbm [shape: f32[16,128], index: 0, kind: input, shape index: {}]   ;;  %s979_s1 = inlined_call_operand.hbm [shape: f32[128,128], index: 1, kind: input, shape index: {}]   ;;  %s980_s2 = inlined_call_operand.hbm [shape: f32[128,128], index: 2, kind: input, shape index: {}]   ;;  %s981_s3 = inlined_call_operand.hbm [shape: f32[128,128], index: 3, kind: input, shape index: {}]   ;;  %s982_s4 = inlined_call_operand.hbm [shape: f32[16,128], index: 4, kind: output, shape index: {}]  }
   0x1   :  { %11 = vsyncpa [#allocation3 + $0x1], 0 }
   0x2   :  { %12 = vsyncpa [#allocation6], 0 }
   0x3   :  { %13 = vsyncpa [#allocation9], 0 }
   0x4   :  { %14 = vsyncpa [#allocation4], 0 }
   0x5   :  { %16 = vsyncpa [#allocation4 + $0x1], 0  ;;  %s815_s15 = smov 0   ;;  %s817_s16 = smov 0  }
   0x6   :  { %s819_s17 = smov 0   ;;  %s821_s18 = smov 0  }
   0x7 LB: > { %s153_s21 = sshll.u32 %s979_s1, 4  ;;  %s839_s22 = sadd.s32 4294967295, %s783_s18   ;;  %s783_s18 = sphi %s821_s18, %s993_s18   ;;  %s779_s17 = sphi %s819_s17, %s992_s17   ;;  %s775_s16 = sphi %s817_s16, %s991_s16   ;;  %s771_s15 = sphi %s815_s15, %s990_s15   ;;  %s154_s21 = int_to_ptr.hbm [resolvable:$true] %s153_s21 }
   0x8   : > { %p493_p0 = scmp.ge.s32.totalorder %s783_s18, 1  ;;  %p43_p1 = scmp.eq.s32.totalorder %s839_s22, 0 }
   0x9   : > { %p142_p2 = scmp.lt.s32.totalorder %s783_s18, 3  ;;  %s785_s24 = smov [#allocation5]  }
   0xa   : > { %s155_s25 = sshll.u32 %s785_s24, 4  ;;  %s167_s28 = sshll.u32 %s980_s2, 4  ;;  %s156_s25 = int_to_ptr.vmem [resolvable:$true] %s155_s25  ;;  %s168_s28 = int_to_ptr.hbm [resolvable:$true] %s167_s28 }
   0xb   : > { %p844_p3 = pnand %p493_p0, %p142_p2  ;;  %s181_s6 = sshll.u32 %s981_s3, 4  ;;  %s182_s6 = int_to_ptr.hbm [resolvable:$true] %s181_s6 }
   0xc   : > { %s786_s7 = smov [#allocation7]   ;;  %s787_s9 = smov 128  }
   0xd   : > { %p526_p4 = pneg %p844_p3  ;;  %s169_s8 = sshll.u32 %s786_s7, 4  ;;  %s170_s8 = int_to_ptr.vmem [resolvable:$true] %s169_s8 }
   0xe   : > { %s788_s10 = smov 8   ;;  %s789_s11 = smov [#allocation8]  }
   0xf   : > { %p856_p6 = pnand %p526_p4, %p43_p1  ;;  %s183_s12 = sshll.u32 %s789_s11, 4  ;;  %s184_s12 = int_to_ptr.vmem [resolvable:$true] %s183_s12 }
  0x10   : > { %s492_s13 = sadd.s32 4294967294, %s783_s18   ;;  %s871_s14 = sadd.s32 1, %s783_s18  }
  0x11   : > { %529 = dma.hbm_to_vmem [thread:$0]  (!%p856_p6), %s154_s21, 2048, %s156_s25, [#allocation6], %s787_s9, %s787_s9, %s788_s10  }
  0x12   : > { %532 = dma.hbm_to_vmem [thread:$0]  (!%p856_p6), %s168_s28, 2048, %s170_s8, [#allocation6], %s787_s9, %s787_s9, %s788_s10  }
  0x13   : > { %535 = dma.hbm_to_vmem [thread:$0]  (!%p856_p6), %s182_s6, 2048, %s184_s12, [#allocation9], %s787_s9, %s787_s9, %s788_s10  }
  0x14   : > { %s29_s19 = sadd.s32 1, %s779_s17  ;;  %s26_s20 = ssub.s32 %s783_s18, %s871_s14 }
  0x15   : > { %p36_p7 = scmp.ne.s32.totalorder %s779_s17, %s775_s16  ;;  %p27_p8 = scmp.eq.s32.totalorder %s26_s20, 0 }
  0x16   : > { %p37_p9 = scmp.eq.s32.totalorder %s783_s18, 0  ;;  %p42_p10 = scmp.ne.s32.totalorder %s775_s16, %s771_s15 }
  0x17   : > { %p129_p11 = scmp.eq.s32.totalorder %s839_s22, 1  ;;  %p135_p0 = scmp.eq.s32.totalorder %s492_s13, 1 }
  0x18   : > { %s883_s21 = scalar_select %p27_p8, %s779_s17, %s29_s19  }
  0x19   : > { %p887_p12 = por %p43_p1, %p42_p10  ;;  %p891_p13 = por %p129_p11, %p36_p7 }
  0x1a   : > { %p38_p2 = por %p37_p9, %p36_p7  ;;  %s197_s26 = sand.u32 1, %s779_s17  }
  0x1b   : > { %p896_p4 = por %p135_p0, %p42_p10  ;;  %p547_p6 = scmp.lt.s32.totalorder %s783_s18, 2 }
  0x1c   : > { %s498_s28 = sshll.u32 %s197_s26, 3  ;;  %s499_s29 = sshll.u32 %s783_s18, 3 }
  0x1d   : > { %s205_s6 = scalar_lea.hbm %s978_s0, %s499_s29  ;;  %s201_s8 = scalar_lea.vmem [#allocation2], %s498_s28 }
  0x1e   : > { %s207_s7 = sshll.u32 %s205_s6, 4  ;;  %s209_s9 = sshll.u32 %s201_s8, 4  ;;  %s208_s7 = int_to_ptr.hbm [resolvable:$true] %s207_s7  ;;  %s210_s9 = int_to_ptr.vmem [resolvable:$true] %s209_s9 }
  0x1f   : > { %p905_p8 = pnand %p547_p6, %p38_p2  ;;  %s198_s11 = scalar_lea.sflag [#allocation3], %s197_s26 }
  0x20   : > { %s679_s12 = sshra.s32 %s208_s7, 4  ;;  %s686_s28 = scalar_lea.hbm %s978_s0, 16  ;;  %s680_s12 = int_to_ptr.hbm [resolvable:$true] %s679_s12 }
  0x21   : > { %s681_s13 = scalar_lea.hbm %s680_s12, 8  ;;  %p683_p9 = pneg %p905_p8 }
  0x22   : > { %p682_p7 = scmp.ne.s32.totalorder %s680_s12, %s681_s13  ;;  %p687_p0 = scmp.lt.s32.totalorder %s680_s12, %s978_s0 }
  0x23   : > { %p688_p2 = scmp.lt.s32.totalorder %s686_s28, %s681_s13 }
  0x24   : > { %p684_p10 = pnand %p683_p9, %p682_p7 }
  0x25   : > { %p689_p6 = por %p688_p2, %p687_p0 }
  0x26   : > { %p685_p11 = pneg %p684_p10 }
  0x28   : > { %p690_p5 = pnand %p689_p6, %p685_p11 }
  0x2a   : > { %693 = shalt.err (!%p690_p5)
}
  0x2b   : > { %539 = dma.hbm_to_vmem [thread:$0]  (!%p905_p8), %s208_s7, 128, %s210_s9, %s198_s11  }
  0x2c   : > { %218 = sbr.rel (%p844_p3) target bundleno = 477 (0x1dd), region = 36  ;;  %s922_s26 = sand.u32 (!%p844_p3), 1, %s775_s16  }
  0x2d   : > { %s501_s5 = sshll.u32 (!%p844_p3), %s922_s26, 3  ;;  %s221_s6 = scalar_lea.sflag (!%p844_p3), [#allocation3], %s922_s26 }
  0x2e   : > { %s928_s8 = scalar_lea.vmem (!%p844_p3), [#allocation2], %s501_s5 }
  0x31   : > { %754 = dma.done.wait (%p887_p12), %s221_s6, 128  }
  0x32   : > { %756 = vsyncadd (%p887_p12), %s221_s6, 4294967168 }
  0x33   : > { %758 = dma.done.wait (%p43_p1), [#allocation6], 4096  }
  0x34   : > { %760 = vsyncadd (%p43_p1), [#allocation6], 4294963200 }
  0x35   : > { %762 = dma.done.wait (%p43_p1), [#allocation9], 2048  }
  0x36   : > { %764 = vsyncadd (%p43_p1), [#allocation9], 4294965248  ;;  %v281_v0 = vld [vmem:[#allocation5 + $0x78] sm:$0xff]  ;;  %v280_v1 = vld [vmem:[#allocation5 + $0x70] sm:$0xff]  ;;  %s507_s23 = sshll.u32 %s839_s22, 3  ;;  %s264_s10 = scalar_lea.vmem [#allocation10], %s501_s5 }
  0x37   : > { %282 = vmatpush.msra.mxu0 %v281_v0  ;;  %v279_v2 = vld [vmem:[#allocation5 + $0x68] sm:$0xff]  ;;  %v278_v3 = vld [vmem:[#allocation5 + $0x60] sm:$0xff]  ;;  %v318_v4 = vld [vmem:[#allocation7 + $0x78] sm:$0xff]  ;;  %s388_s9 = scalar_lea.hbm %s982_s4, %s507_s23  ;;  %s390_s11 = sshll.u32 %s264_s10, 4  ;;  %s391_s11 = int_to_ptr.vmem [resolvable:$true] %s390_s11 }
  0x38   : > { %v277_v5 = vld [vmem:[#allocation5 + $0x58] sm:$0xff]  ;;  %319 = vmatpush.msra.mxu1 %v318_v4  ;;  %v317_v6 = vld [vmem:[#allocation7 + $0x70] sm:$0xff]  ;;  %v316_v7 = vld [vmem:[#allocation7 + $0x68] sm:$0xff]  ;;  %s392_s12 = sshll.u32 %s388_s9, 4  ;;  %s378_s13 = scalar_lea.sflag [#allocation4], %s922_s26  ;;  %s393_s12 = int_to_ptr.hbm [resolvable:$true] %s392_s12 }
  0x39   : > { %283 = vmatpush.msra.mxu0 %v280_v1  ;;  %v276_v8 = vld [vmem:[#allocation5 + $0x50] sm:$0xff]  ;;  %v315_v9 = vld [vmem:[#allocation7 + $0x60] sm:$0xff]  ;;  %v275_v10 = vld [vmem:[#allocation5 + $0x48] sm:$0xff]  ;;  %s723_s19 = sshra.s32 %s393_s12, 4  ;;  %s729_s29 = scalar_lea.hbm %s982_s4, 16  ;;  %s724_s19 = int_to_ptr.hbm [resolvable:$true] %s723_s19 }
  0x3a   : > { %320 = vmatpush.msra.mxu1 %v317_v6  ;;  %v314_v11 = vld [vmem:[#allocation7 + $0x58] sm:$0xff]  ;;  %v274_v12 = vld [vmem:[#allocation5 + $0x40] sm:$0xff]  ;;  %v313_v13 = vld [vmem:[#allocation7 + $0x50] sm:$0xff]  ;;  %s725_s20 = scalar_lea.hbm %s724_s19, 8  ;;  %p730_p12 = scmp.lt.s32.totalorder %s724_s19, %s982_s4 }
  0x3b   : > { %284 = vmatpush.msra.mxu0 %v279_v2  ;;  %v273_v14 = vld [vmem:[#allocation5 + $0x38] sm:$0xff]  ;;  %v312_v15 = vld [vmem:[#allocation7 + $0x48] sm:$0xff]  ;;  %v272_v16 = vld [vmem:[#allocation5 + $0x30] sm:$0xff]  ;;  %p726_p1 = scmp.ne.s32.totalorder %s724_s19, %s725_s20  ;;  %p731_p8 = scmp.lt.s32.totalorder %s729_s29, %s725_s20 }
  0x3c   : > { %321 = vmatpush.msra.mxu1 %v316_v7  ;;  %v311_v17 = vld [vmem:[#allocation7 + $0x40] sm:$0xff]  ;;  %v271_v18 = vld [vmem:[#allocation5 + $0x28] sm:$0xff]  ;;  %v310_v19 = vld [vmem:[#allocation7 + $0x38] sm:$0xff] }
  0x3d   : > { %285 = vmatpush.msra.mxu0 %v278_v3  ;;  %v270_v20 = vld [vmem:[#allocation5 + $0x20] sm:$0xff]  ;;  %v309_v21 = vld [vmem:[#allocation7 + $0x30] sm:$0xff]  ;;  %v269_v22 = vld [vmem:[#allocation5 + $0x18] sm:$0xff]  ;;  %p727_p3 = pnand %p726_p1, %p891_p13  ;;  %p732_p7 = por %p731_p8, %p730_p12 }
  0x3e   : > { %322 = vmatpush.msra.mxu1 %v315_v9  ;;  %v308_v23 = vld [vmem:[#allocation7 + $0x28] sm:$0xff]  ;;  %v268_v24 = vld [vmem:[#allocation5 + $0x10] sm:$0xff]  ;;  %v307_v25 = vld [vmem:[#allocation7 + $0x20] sm:$0xff] }
  0x3f   : > { %286 = vmatpush.msra.mxu0 %v277_v5  ;;  %v267_v26 = vld [vmem:[#allocation5 + $0x8] sm:$0xff]  ;;  %v306_v27 = vld [vmem:[#allocation7 + $0x18] sm:$0xff]  ;;  %v266_v28 = vld [vmem:[#allocation5] sm:$0xff]  ;;  %p728_p5 = pneg %p727_p3 }
  0x40   : > { %323 = vmatpush.msra.mxu1 %v314_v11  ;;  %v265_v29 = vld [vmem:[%s928_s8] sm:$0xff]  ;;  %v304_v31 = vld [vmem:[#allocation7 + $0x8] sm:$0xff]  ;;  %v303_v32 = vld [vmem:[#allocation7] sm:$0xff] }
  0x41   : > { %287 = vmatpush.msra.mxu0 %v276_v8  ;;  %v305_v30 = vld [vmem:[#allocation7 + $0x10] sm:$0xff]  ;;  %v355_v33 = vld [vmem:[#allocation8 + $0x78] sm:$0xff]  ;;  %v353_v35 = vld [vmem:[#allocation8 + $0x68] sm:$0xff]  ;;  %p733_p9 = pnand %p732_p7, %p728_p5 }
  0x42   : > { %324 = vmatpush.msra.mxu1 %v313_v13  ;;  %v354_v34 = vld [vmem:[#allocation8 + $0x70] sm:$0xff]  ;;  %356 = vmatpush.msra.mxu2 %v355_v33  ;;  %v352_v36 = vld [vmem:[#allocation8 + $0x60] sm:$0xff]  ;;  %v351_v37 = vld [vmem:[#allocation8 + $0x58] sm:$0xff] }
  0x43   : > { %288 = vmatpush.msra.mxu0 %v275_v10  ;;  %v350_v38 = vld [vmem:[#allocation8 + $0x50] sm:$0xff]  ;;  %v349_v39 = vld [vmem:[#allocation8 + $0x48] sm:$0xff]  ;;  %v348_v40 = vld [vmem:[#allocation8 + $0x40] sm:$0xff] }
  0x44   : > { %325 = vmatpush.msra.mxu1 %v312_v15  ;;  %357 = vmatpush.msra.mxu2 %v354_v34  ;;  %v347_v41 = vld [vmem:[#allocation8 + $0x38] sm:$0xff]  ;;  %v346_v42 = vld [vmem:[#allocation8 + $0x30] sm:$0xff]  ;;  %v345_v43 = vld [vmem:[#allocation8 + $0x28] sm:$0xff] }
  0x45   : > { %289 = vmatpush.msra.mxu0 %v274_v12  ;;  %v344_v44 = vld [vmem:[#allocation8 + $0x20] sm:$0xff]  ;;  %v343_v45 = vld [vmem:[#allocation8 + $0x18] sm:$0xff]  ;;  %v342_v46 = vld [vmem:[#allocation8 + $0x10] sm:$0xff] }
  0x46   : > { %326 = vmatpush.msra.mxu1 %v311_v17  ;;  %358 = vmatpush.msra.mxu2 %v353_v35  ;;  %v341_v49 = vld [vmem:[#allocation8 + $0x8] sm:$0xff]  ;;  %v340_v50 = vld [vmem:[#allocation8] sm:$0xff] }
  0x47   : > { %290 = vmatpush.msra.mxu0 %v273_v14 }
  0x48   : > { %327 = vmatpush.msra.mxu1 %v310_v19  ;;  %359 = vmatpush.msra.mxu2 %v352_v36 }
  0x49   : > { %291 = vmatpush.msra.mxu0 %v272_v16 }
  0x4a   : > { %328 = vmatpush.msra.mxu1 %v309_v21  ;;  %360 = vmatpush.msra.mxu2 %v351_v37 }
  0x4b   : > { %292 = vmatpush.msra.mxu0 %v271_v18 }
  0x4c   : > { %329 = vmatpush.msra.mxu1 %v308_v23  ;;  %361 = vmatpush.msra.mxu2 %v350_v38 }
  0x4d   : > { %293 = vmatpush.msra.mxu0 %v270_v20 }
  0x4e   : > { %330 = vmatpush.msra.mxu1 %v307_v25  ;;  %362 = vmatpush.msra.mxu2 %v349_v39 }
  0x4f   : > { %294 = vmatpush.msra.mxu0 %v269_v22 }
  0x50   : > { %331 = vmatpush.msra.mxu1 %v306_v27  ;;  %363 = vmatpush.msra.mxu2 %v348_v40 }
  0x51   : > { %295 = vmatpush.msra.mxu0 %v268_v24 }
  0x52   : > { %332 = vmatpush.msra.mxu1 %v305_v30  ;;  %364 = vmatpush.msra.mxu2 %v347_v41 }
  0x53   : > { %296 = vmatpush.msra.mxu0 %v267_v26 }
  0x54   : > { %333 = vmatpush.msra.mxu1 %v304_v31  ;;  %365 = vmatpush.msra.mxu2 %v346_v42 }
  0x55   : > { %297 = vmatpush.msra.mxu0 %v266_v28 }
  0x56   : > { %298 = vmatmul.f32.vlgmr.msra.gmra.mxu0 %v265_v29  ;;  %334 = vmatpush.msra.mxu1 %v303_v32 }
  0x57   : > { %366 = vmatpush.msra.mxu2 %v345_v43 }
  0x59   : > { %367 = vmatpush.msra.mxu2 %v344_v44 }
  0x5b   : > { %368 = vmatpush.msra.mxu2 %v343_v45 }
  0x5d   : > { %369 = vmatpush.msra.mxu2 %v342_v46 }
  0x5f   : > { %370 = vmatpush.msra.mxu2 %v341_v49 }
  0x61   : > { %371 = vmatpush.msra.mxu2 %v340_v50 }
  0xd3   : > { %v299_v47 = vpop.f32.mrf.mxu0 }
  0xd4   : > { %v302_v48 = vmax.f32 %v299_v47, 0.0 }
  0xd6   : > { %335 = vmatmul.f32.vlgmr.msra.gmra.mxu1 %v302_v48 }
 0x153   : > { %v336_v51 = vpop.f32.mrf.mxu1 }
 0x154   : > { %v339_v52 = vmax.f32 %v336_v51, 0.0 }
 0x156   : > { %372 = vmatmul.f32.vlgmr.msra.gmra.mxu2 %v339_v52 }
 0x1d9   : > { %v373_v53 = vpop.f32.mrf.mxu2 }
 0x1da   : > { %376 = vst [vmem:[%s264_s10] sm:$0xff] %v373_v53 }
 0x1db   : > { %736 = shalt.err (!%p733_p9)
}
 0x1dc   : > { %524 = dma.vmem_to_hbm [thread:$0]  (%p891_p13), %s391_s11, 128, %s393_s12, %s378_s13  }
 0x1dd PF: > { %s404_s26 = sand.u32 1, %s771_s15   ;;  %p989_p10 = scmp.ge.s32.totalorder %s783_s18, 2 }
 0x1de   : > { %s405_s6 = scalar_lea.sflag [#allocation4], %s404_s26 }
 0x1df   : > { %p541_p11 = pnand %p989_p10, %p896_p4 }
 0x1e1   : > { %p542_p0 = pneg %p541_p11 }
 0x1e3   : > { %766 = dma.done.wait (%p542_p0), %s405_s6, 128  }
 0x1e4   : > { %768 = vsyncadd (%p542_p0), %s405_s6, 4294967168  ;;  %p19_p2 = scmp.ge.s32.totalorder %s871_s14, 4   ;;  %s990_s15 = smov %s775_s16 }
 0x1e5   : > { %s991_s16 = smov %s779_s17  ;;  %s992_s17 = smov %s883_s21 }
 0x1e6   : > { %s993_s18 = smov %s871_s14  ;;  %21 = sbr.rel (!%p19_p2) target bundleno = 7 (0x7), region = 93 }
 0x1eb   :  { %411 = vsyncpa [#allocation3], 1 }
 0x1ec   :  { %413 = vsyncpa [#allocation3 + $0x1], 1 }
 0x1ed   :  { %414 = vsyncpa [#allocation6], 1 }
 0x1ee   :  { %415 = vsyncpa [#allocation9], 1 }
 0x1ef   :  { %416 = vsyncpa [#allocation4], 1 }
 0x1f0   :  { %418 = vsyncpa [#allocation4 + $0x1], 1 }

</bundles_post_ra>
